<compile_context>
chip_gen: v7x
topology: tpu7x:2x2x1
jax: 0.10.0
libtpu: 0.0.40
codegen_flags: <defaults>
</compile_context>

<pallas_src>
import functools
import math

import jax
import jax.numpy as jnp
from jax.experimental import pallas as pl
from jax.experimental.pallas import tpu as pltpu

_LANE = 128
_MIN_GRID_STEPS = 4           # target grid steps for large inputs (v7x megacore)
_MAX_PACKED_COLS = 16384      # don't lane-pack beyond this packed width


def _sublane_multiple(dtype) -> int:
    # f32 packs 8 rows per vreg, bf16 16, int8/fp8 32.
    return max(8, 32 // jnp.dtype(dtype).itemsize)


@functools.lru_cache(maxsize=None)
def _vmem_limit_bytes() -> int:
    """Generation-aware limit: ~half physical VMEM (64 MiB v5e/v6e, 32 MiB v7x)."""
    phys = 64 * 1024 * 1024          # conservative fallback (v7x-sized part)
    try:
        info_fn = getattr(pltpu, "get_tpu_info", None)
        if info_fn is not None:
            phys = int(getattr(info_fn(), "vmem_capacity_bytes", phys))
    except Exception:
        pass
    return max(32 * 1024 * 1024, min(96 * 1024 * 1024, phys // 2))


def _tile_budget_bytes() -> int:
    # Half the limit for pipelined tiles; the rest covers resident rows,
    # partial outputs and compiler scratch.
    return _vmem_limit_bytes() // 2


def _lane_pack_factor(d: int) -> int:
    """k such that viewing X as (n/k, k*d) makes the last dim a multiple of 128."""
    k = _LANE // math.gcd(d, _LANE)
    if k == 1 or k * d > _MAX_PACKED_COLS:
        return 1                      # already lane-dense, or d too wide to pack
    return k


def _pack_rows(x, k):
    """View (n, d) as (ceil(n/k), k*d). Rows edge-padded (duplicates are harmless)."""
    n, d = x.shape
    if k <= 1:
        return x, 0
    pad = (-n) % k
    if pad:
        # NOTE: jnp.pad materialises one extra copy of X; only taken when n % k != 0.
        x = jnp.pad(x, ((0, pad), (0, 0)), mode="edge")
    return x.reshape((n + pad) // k, k * d), pad


def _pick_block_rows(n_rows, n_cols, dtype, *, n_buffers, min_grid=1):
    """Largest sublane-aligned row tile whose PADDED footprint fits the budget."""
    itemsize = jnp.dtype(dtype).itemsize
    sub = _sublane_multiple(dtype)
    lane_cols = ((n_cols + _LANE - 1) // _LANE) * _LANE        # lane padding
    row_bytes = lane_cols * itemsize
    rows = max(1, _tile_budget_bytes() // max(1, n_buffers * row_bytes))
    if min_grid > 1 and n_rows >= min_grid * sub:
        # Cap so large inputs get >= min_grid steps (megacore on v7x; cheap elsewhere).
        cap = -(-n_rows // min_grid)
        cap = max(sub, ((cap + sub - 1) // sub) * sub)
        rows = min(rows, cap)
    if rows >= n_rows:
        return n_rows
    return min(n_rows, max(sub, (rows // sub) * sub))


# ----------------------------------------------------------------------------
# fit: fully parallel per-block partial min/max + tiny jnp combine epilogue
# ----------------------------------------------------------------------------
def _fit_partial_kernel(x_ref, min_ref, max_ref, *, n_rows, block_rows, needs_mask):
    x = x_ref[...].astype(jnp.float32)                        # (block_rows, d_p)

    def _reduce(x_lo, x_hi):
        min_ref[...] = jnp.min(x_lo, axis=0, keepdims=True)[None]
        max_ref[...] = jnp.max(x_hi, axis=0, keepdims=True)[None]

    if needs_mask:
        i = pl.program_id(0)
        last = pl.num_programs(0) - 1

        @pl.when(i < last)
        def _steady():                                        # unmasked steady state
            _reduce(x, x)

        @pl.when(i == last)
        def _tail():                                          # mask garbage pad rows
            valid = (jax.lax.broadcasted_iota(jnp.int32, x.shape, 0)
                     < (n_rows - i * block_rows))
            _reduce(jnp.where(valid, x, jnp.inf), jnp.where(valid, x, -jnp.inf))
    else:
        _reduce(x, x)


def minmax_fit(x, feature_range=(0.0, 1.0), *, block_rows=None):
    """Column-wise min/max fit.  Returns a dict of (1, d) statistic rows."""
    n, d = x.shape
    fr_lo, fr_hi = float(feature_range[0]), float(feature_range[1])

    k = _lane_pack_factor(d)
    x_in, _ = _pack_rows(x, k)
    n_p, d_p = x_in.shape

    if block_rows is None:
        block_rows = _pick_block_rows(n_p, d_p, x.dtype, n_buffers=2,
                                      min_grid=_MIN_GRID_STEPS)
    block_rows = max(1, min(int(block_rows), n_p))
    num_blocks = pl.cdiv(n_p, block_rows)
    needs_mask = (n_p % block_rows) != 0

    kernel = functools.partial(_fit_partial_kernel, n_rows=n_p,
                               block_rows=block_rows, needs_mask=needs_mask)
    part_shape = jax.ShapeDtypeStruct((num_blocks, 1, d_p), jnp.float32)
    part_spec = pl.BlockSpec((1, 1, d_p), lambda i: (i, 0, 0))
    pmin, pmax = pl.pallas_call(
        kernel,
        out_shape=(part_shape, part_shape),
        grid_spec=pltpu.PrefetchScalarGridSpec(
            num_scalar_prefetch=0,
            grid=(num_blocks,),
            in_specs=[pl.BlockSpec((block_rows, d_p), lambda i: (i, 0))],
            out_specs=(part_spec, part_spec),
        ),
        compiler_params=pltpu.CompilerParams(
            dimension_semantics=("parallel",),          # independent partials
            vmem_limit_bytes=_vmem_limit_bytes(),
        ),
    )(x_in)

    # Tiny epilogue: fold grid blocks and the k packed lane segments, then derive
    # range / inverse range and the fused affine offsets (all on (·, d) arrays).
    mn32 = jnp.min(pmin.reshape(num_blocks * k, d), axis=0, keepdims=True)
    mx32 = jnp.max(pmax.reshape(num_blocks * k, d), axis=0, keepdims=True)
    span = mx32 - mn32
    rng32 = (fr_hi - fr_lo) / span          # matches PyTorch: no constant-feature guard
    inv32 = span / (fr_hi - fr_lo)
    off32 = fr_lo - mn32 * rng32            # forward : y = x * range     + off
    ioff32 = mn32 - fr_lo * inv32           # inverse : x = y * inv_range + ioff
    dt = x.dtype
    return {
        "min": mn32.astype(dt), "max": mx32.astype(dt),
        "range": rng32.astype(dt), "inv_range": inv32.astype(dt),
        "offset": off32.astype(dt), "inv_offset": ioff32.astype(dt),
    }


# ----------------------------------------------------------------------------
# transform / inverse_transform: shared fused affine kernel  o = x*scale + off
# ----------------------------------------------------------------------------
def _affine_kernel(x_ref, scale_ref, off_ref, o_ref):
    o_ref[...] = (x_ref[...] * scale_ref[...] + off_ref[...]).astype(o_ref.dtype)


def minmax_affine(x, scale_row, off_row):
    n, d = x.shape
    k = _lane_pack_factor(d)
    x_in, pad = _pack_rows(x, k)
    if k > 1:
        scale_in = jnp.tile(scale_row, (1, k)).astype(x.dtype)
        off_in = jnp.tile(off_row, (1, k)).astype(x.dtype)
    else:
        scale_in = scale_row.astype(x.dtype)
        off_in = off_row.astype(x.dtype)
    n_p, d_p = x_in.shape

    # Input + output tiles, each double-buffered -> 4 tile copies vs the budget.
    block_rows = _pick_block_rows(n_p, d_p, x.dtype, n_buffers=4,
                                  min_grid=_MIN_GRID_STEPS)
    grid = (pl.cdiv(n_p, block_rows),)

    out = pl.pallas_call(
        _affine_kernel,
        out_shape=jax.ShapeDtypeStruct((n_p, d_p), x.dtype),
        grid_spec=pltpu.PrefetchScalarGridSpec(
            num_scalar_prefetch=0,
            grid=grid,
            in_specs=[
                pl.BlockSpec((block_rows, d_p), lambda i: (i, 0)),   # X tile
                pl.BlockSpec((1, d_p), lambda i: (0, 0)),            # scale (resident)
                pl.BlockSpec((1, d_p), lambda i: (0, 0)),            # offset (resident)
            ],
            out_specs=pl.BlockSpec((block_rows, d_p), lambda i: (i, 0)),
        ),
        compiler_params=pltpu.CompilerParams(
            dimension_semantics=("parallel",),
            vmem_limit_bytes=_vmem_limit_bytes(),
        ),
    )(x_in, scale_in, off_in)

    if k > 1:
        out = out.reshape(n + pad, d)
        if pad:
            out = out[:n]
    return out


# ----------------------------------------------------------------------------
# Thin module-like wrapper mirroring the PyTorch API
# ----------------------------------------------------------------------------
class MinMaxScaler:
    def __init__(self, dim, feature_range=(0, 1)):
        self.dim = dim
        self.feature_range = feature_range
        self.min = None            # (1, dim)
        self.max = None            # (1, dim)
        self.range = None          # (1, dim)
        self._inv_range = None
        self._offset = None
        self._inv_offset = None
        self.is_fit = False        # host-side flag (mirrors the torch buffer)

    def fit(self, X):
        s = minmax_fit(X, self.feature_range)
        self.min, self.max, self.range = s["min"], s["max"], s["range"]
        self._inv_range, self._offset, self._inv_offset = (
            s["inv_range"], s["offset"], s["inv_offset"])
        self.is_fit = True
        return self

    def _check_if_fit(self):
        if not self.is_fit:
            raise ValueError("Scaler has not been fit yet. Call .fit first.")

    def forward(self, X):
        # feature_range[0] + (X - min) * range  ==  X * range + offset
        self._check_if_fit()
        return minmax_affine(X, self.range, self._offset)

    __call__ = forward
    transform = forward

    def inverse_transform(self, X):
        # min + (X - feature_range[0]) / range  ==  X * inv_range + inv_offset
        self._check_if_fit()
        return minmax_affine(X, self._inv_range, self._inv_offset)


if __name__ == "__main__":
    key = jax.random.PRNGKey(0)
    k1, k2, k3, k4, k5 = jax.random.split(key, 5)
    feature_range = (0.0, 1.0)

    # Main small case: n=8 samples, d=32 features (lane-packed path, k = 4).
    n, d = 8, 32
    x_fit = jax.random.normal(k1, (n, d), dtype=jnp.float32) * 3.0 + 1.5
    x_new = jax.random.normal(k2, (n, d), dtype=jnp.float32) * 3.0 + 1.5

    scaler = MinMaxScaler(dim=d, feature_range=feature_range).fit(x_fit)
    y = scaler(x_new)
    y_inv = scaler.inverse_transform(y)
    jax.block_until_ready((y, y_inv))

    ref_min = jnp.min(x_fit, axis=0)
    ref_max = jnp.max(x_fit, axis=0)
    ref_rng = (feature_range[1] - feature_range[0]) / (ref_max - ref_min)
    y_ref = feature_range[0] + (x_new - ref_min) * ref_rng

    assert jnp.allclose(scaler.min[0], ref_min, atol=1e-6), "fit min mismatch"
    assert jnp.allclose(scaler.max[0], ref_max, atol=1e-6), "fit max mismatch"
    assert jnp.allclose(scaler.range[0], ref_rng, atol=1e-5, rtol=1e-5), "fit range mismatch"
    assert jnp.allclose(y, y_ref, atol=1e-5, rtol=1e-5), "forward mismatch"
    assert jnp.allclose(y_inv, x_new, atol=1e-4, rtol=1e-4), "inverse mismatch"

    # Row count not a multiple of the pack factor (exercises edge padding + slice).
    x_odd = jax.random.normal(k3, (6, d), dtype=jnp.float32) * 2.0 - 0.5
    y_odd = scaler(x_odd)
    jax.block_until_ready(y_odd)
    y_odd_ref = feature_range[0] + (x_odd - ref_min) * ref_rng
    assert jnp.allclose(y_odd, y_odd_ref, atol=1e-5, rtol=1e-5), "padded forward mismatch"

    # Multi-block fit with a partial last block (exercises last-step-only masking).
    x_big = jax.random.normal(k4, (80, d), dtype=jnp.float32) * 2.0 + 0.5
    s_big = minmax_fit(x_big, feature_range, block_rows=8)   # packed (20,128) -> 3 blocks
    jax.block_until_ready(s_big["min"])
    assert jnp.allclose(s_big["min"][0], jnp.min(x_big, axis=0), atol=1e-6), "masked fit min mismatch"
    assert jnp.allclose(s_big["max"][0], jnp.max(x_big, axis=0), atol=1e-6), "masked fit max mismatch"

    # Already lane-dense feature dim (k = 1 path).
    n2, d2 = 16, 128
    x2 = jax.random.normal(k5, (n2, d2), dtype=jnp.float32) * 1.7 - 0.3
    sc2 = MinMaxScaler(dim=d2, feature_range=feature_range).fit(x2)
    y2 = sc2(x2)
    jax.block_until_ready(y2)
    mn2 = jnp.min(x2, axis=0)
    mx2 = jnp.max(x2, axis=0)
    y2_ref = (x2 - mn2) / (mx2 - mn2)
    assert jnp.allclose(y2, y2_ref, atol=1e-5, rtol=1e-5), "k=1 forward mismatch"

    print("KERNEL_OK")
</pallas_src>

<mosaic_0001>
module attributes {stable_mosaic.version = 11 : i64} {
  func.func @_fit_partial_kernel(%arg0: i32, %arg1: memref<2x128xf32, #tpu.memory_space<vmem>>, %arg2: memref<1x1x128xf32, #tpu.memory_space<vmem>>, %arg3: memref<1x1x128xf32, #tpu.memory_space<vmem>>) attributes {dimension_semantics = [#tpu.dimension_semantics<parallel>], iteration_bounds = array<i64: 1>, scalar_prefetch = 0 : i64, scratch_operands = 0 : i64, tpu.core_type = #tpu.core_type<tc>, window_params = [{transform_indices = @transform_0, window_bounds = array<i64: 2, 128>}, {transform_indices = @transform_1, window_bounds = array<i64: 1, 1, 128>}, {transform_indices = @transform_2, window_bounds = array<i64: 1, 1, 128>}]} {
    %c0 = arith.constant 0 : index
    %c0_0 = arith.constant 0 : index
    %0 = vector.load %arg1[%c0, %c0_0] : memref<2x128xf32, #tpu.memory_space<vmem>>, vector<2x128xf32>
    %cst = arith.constant dense<0x7F800000> : vector<128xf32>
    %1 = vector.multi_reduction <minimumf>, %0, %cst [0] : vector<2x128xf32> to vector<128xf32>
    %2 = vector.shape_cast %1 : vector<128xf32> to vector<1x128xf32>
    %3 = vector.shape_cast %2 : vector<1x128xf32> to vector<1x1x128xf32>
    %c0_1 = arith.constant 0 : index
    %c0_2 = arith.constant 0 : index
    %c0_3 = arith.constant 0 : index
    %4 = vector.load %arg2[%c0_1, %c0_2, %c0_3] : memref<1x1x128xf32, #tpu.memory_space<vmem>>, vector<1x1x128xf32>
    tpu.vector_store %arg2[%c0_1, %c0_2, %c0_3], %3 {strides = array<i32>} : memref<1x1x128xf32, #tpu.memory_space<vmem>>, vector<1x1x128xf32>,
    %cst_4 = arith.constant dense<0xFF800000> : vector<128xf32>
    %5 = vector.multi_reduction <maximumf>, %0, %cst_4 [0] : vector<2x128xf32> to vector<128xf32>
    %6 = vector.shape_cast %5 : vector<128xf32> to vector<1x128xf32>
    %7 = vector.shape_cast %6 : vector<1x128xf32> to vector<1x1x128xf32>
    %c0_5 = arith.constant 0 : index
    %c0_6 = arith.constant 0 : index
    %c0_7 = arith.constant 0 : index
    %8 = vector.load %arg3[%c0_5, %c0_6, %c0_7] : memref<1x1x128xf32, #tpu.memory_space<vmem>>, vector<1x1x128xf32>
    tpu.vector_store %arg3[%c0_5, %c0_6, %c0_7], %7 {strides = array<i32>} : memref<1x1x128xf32, #tpu.memory_space<vmem>>, vector<1x1x128xf32>,
    return
  }
  func.func @transform_0(%arg0: i32) -> (i32, i32) {
    %c0_i32 = arith.constant 0 : i32
    %c0_i32_0 = arith.constant 0 : i32
    return %arg0, %c0_i32 : i32, i32
  }
  func.func @transform_1(%arg0: i32) -> (i32, i32, i32) {
    %c0_i32 = arith.constant 0 : i32
    %c0_i32_0 = arith.constant 0 : i32
    %c0_i32_1 = arith.constant 0 : i32
    return %arg0, %c0_i32, %c0_i32_0 : i32, i32, i32
  }
  func.func @transform_2(%arg0: i32) -> (i32, i32, i32) {
    %c0_i32 = arith.constant 0 : i32
    %c0_i32_0 = arith.constant 0 : i32
    %c0_i32_1 = arith.constant 0 : i32
    return %arg0, %c0_i32, %c0_i32_0 : i32, i32, i32
  }
}

</mosaic_0001>

<bundles_post_ra>
// kernel: tpu_custom_call.1
= control target key start
LH: loop header
LB: loop body
LE: loop exit
PB: predicated region body
PF: predicated region fallthrough
CT: control target
= control target key end

     0   :  { %8 = vsyncpa [#allocation3], 0  ;;  %s208_s0 = inlined_call_operand.hbm [shape: f32[2,128], index: 0, kind: input, shape index: {}]   ;;  %s209_s1 = inlined_call_operand.hbm [shape: f32[1,1,128], index: 1, kind: output, shape index: {0}]   ;;  %s210_s2 = inlined_call_operand.hbm [shape: f32[1,1,128], index: 2, kind: output, shape index: {1}]  }
   0x1   :  { %9 = vsyncpa [#allocation4], 0 }
   0x2   :  { %10 = vsyncpa [#allocation7], 0  ;;  %s146_s9 = smov [#allocation2]   ;;  %s74_s13 = scalar_lea.hbm %s208_s0, 32 }
   0x3   :  { %s17_s10 = sshll.u32 %s146_s9, 4  ;;  %p75_p0 = scmp.ne.s32.totalorder %s208_s0, %s74_s13  ;;  %s18_s10 = int_to_ptr.vmem [resolvable:$true] %s17_s10 }
   0x4   :  { %p78_p1 = scmp.lt.u32.totalorder %s74_s13, %s208_s0 }
   0x6   :  { %p80_p2 = pnand %p78_p1, %p75_p0 }
   0x8   :  { %83 = shalt.err (!%p80_p2)
}
   0x9   :  { %s84_s18 = scalar_lea.vmem %s18_s10, 32  ;;  %p89_p4 = scmp.lt.s32.totalorder %s18_s10, %s18_s10 }
   0xa   :  { %p85_p3 = scmp.ne.s32.totalorder %s18_s10, %s84_s18  ;;  %p90_p5 = scmp.lt.s32.totalorder %s84_s18, %s84_s18 }
   0xc   :  { %p91_p6 = por %p90_p5, %p89_p4 }
   0xe   :  { %p92_p7 = pnand %p91_p6, %p85_p3 }
  0x10   :  { %95 = shalt.err (!%p92_p7)
}
  0x11   :  { %20 = dma.hbm_to_vmem [thread:$0]  %s208_s0, 32, %s18_s10, [#allocation3]  }
  0x12   :  { %140 = dma.done.wait [#allocation3], 32  }
  0x13   :  { %141 = vsyncadd [#allocation3], 4294967264  ;;  %vm25_vm0 = vcmask 1041408   ;;  %v24_v0 = vld [vmem:[#allocation2] sm:$0x3]  ;;  %s147_s21 = smov [#allocation5]  }
  0x14   :  { %v26_v1 = vsel %vm25_vm0, %v24_v0, inf  ;;  %v34_v2 = vsel %vm25_vm0, %v24_v0, -inf  ;;  %s48_s22 = sshll.u32 %s147_s21, 4  ;;  %s148_s23 = smov [#allocation6]   ;;  %s49_s22 = int_to_ptr.vmem [resolvable:$true] %s48_s22 }
  0x15   :  { %v27_v3 = vrot.slane %v26_v1, 4  ;;  %v35_v4 = vrot.slane %v34_v2, 4  ;;  %s58_s0 = sshll.u32 %s148_s23, 4  ;;  %s96_s24 = scalar_lea.vmem %s49_s22, 16  ;;  %s176_s0 = int_to_ptr.vmem [resolvable:$true] %s58_s0 }
  0x16   :  { %p97_p8 = scmp.ne.s32.totalorder %s49_s22, %s96_s24  ;;  %s100_s25 = scalar_lea.vmem %s49_s22, 32 }
  0x17   :  { %v28_v5 = vmin.f32 %v26_v1, %v27_v3  ;;  %v36_v6 = vmax.f32 %v34_v2, %v35_v4  ;;  %p101_p9 = scmp.lt.s32.totalorder %s49_s22, %s49_s22  ;;  %p102_p10 = scmp.lt.s32.totalorder %s100_s25, %s96_s24 }
  0x19   :  { %v29_v7 = vrot.slane %v28_v5, 2  ;;  %v37_v8 = vrot.slane %v36_v6, 2  ;;  %p103_p11 = por %p102_p10, %p101_p9 }
  0x1b   :  { %v30_v9 = vmin.f32 %v28_v5, %v29_v7  ;;  %v38_v10 = vmax.f32 %v36_v6, %v37_v8  ;;  %p104_p12 = pnand %p103_p11, %p97_p8 }
  0x1d   :  { %v31_v11 = vrot.slane %v30_v9, 1  ;;  %v39_v12 = vrot.slane %v38_v10, 1 }
  0x1f   :  { %v32_v13 = vmin.f32 %v30_v9, %v31_v11  ;;  %v40_v14 = vmax.f32 %v38_v10, %v39_v12 }
  0x21   :  { %33 = vst [vmem:[#allocation5] sm:$0x1] %v32_v13  ;;  %41 = vst [vmem:[#allocation6] sm:$0x1] %v40_v14 }
  0x22   :  { %107 = shalt.err (!%p104_p12)
}
  0x23   :  { %s108_s28 = scalar_lea.hbm %s209_s1, 16 }
  0x24   :  { %p109_p13 = scmp.ne.s32.totalorder %s209_s1, %s108_s28  ;;  %p112_p0 = scmp.lt.u32.totalorder %s108_s28, %s209_s1 }
  0x26   :  { %p114_p1 = pnand %p112_p0, %p109_p13 }
  0x28   :  { %117 = shalt.err (!%p114_p1)
}
  0x29   :  { %51 = dma.vmem_to_hbm [thread:$0]  %s49_s22, 16, %s209_s1, [#allocation4]  }
  0x2a   :  { %s118_s7 = scalar_lea.vmem %s176_s0, 16  ;;  %s122_s8 = scalar_lea.vmem %s176_s0, 32 }
  0x2b   :  { %p119_p2 = scmp.ne.s32.totalorder %s176_s0, %s118_s7  ;;  %p123_p3 = scmp.lt.s32.totalorder %s176_s0, %s176_s0 }
  0x2c   :  { %p124_p4 = scmp.lt.s32.totalorder %s122_s8, %s118_s7 }
  0x2e   :  { %p125_p5 = por %p124_p4, %p123_p3 }
  0x30   :  { %p126_p6 = pnand %p125_p5, %p119_p2 }
  0x32   :  { %129 = shalt.err (!%p126_p6)
}
  0x33   :  { %s130_s11 = scalar_lea.hbm %s210_s2, 16 }
  0x34   :  { %p131_p7 = scmp.ne.s32.totalorder %s210_s2, %s130_s11  ;;  %p134_p8 = scmp.lt.u32.totalorder %s130_s11, %s210_s2 }
  0x36   :  { %p136_p9 = pnand %p134_p8, %p131_p7 }
  0x38   :  { %139 = shalt.err (!%p136_p9)
}
  0x39   :  { %61 = dma.vmem_to_hbm [thread:$0]  %s176_s0, 16, %s210_s2, [#allocation7]  }
  0x3a   :  { %142 = dma.done.wait [#allocation4], 16  }
  0x3b   :  { %143 = vsyncadd [#allocation4], 4294967280 }
  0x3c   :  { %144 = dma.done.wait [#allocation7], 16  }
  0x3d   :  { %145 = vsyncadd [#allocation7], 4294967280 }
  0x3e   :  { %68 = vsyncpa [#allocation3], 1 }
  0x3f   :  { %69 = vsyncpa [#allocation4], 1 }
  0x40   :  { %70 = vsyncpa [#allocation7], 1 }

</bundles_post_ra>
